<compile_context>
chip_gen: v7x
topology: tpu7x:2x2x1
jax: 0.10.0
libtpu: 0.0.40
codegen_flags: <defaults>
</compile_context>

<pallas_src>
import jax
import jax.numpy as jnp
from jax.experimental import pallas as pl
from jax.experimental.pallas import tpu as pltpu


def _fused_inception_matmul_kernel(w_ref, slab_ref, o_ref):
    # w_ref:    (B*F, K*C)  fused, flattened branch weights
    # slab_ref: (K*C, TN)   im2col slab tile (lane-dense minor dim)
    # o_ref:    (B*F, TN)   fused branch outputs (lane-dense minor dim)
    o_ref[...] = jax.lax.dot_general(
        w_ref[...], slab_ref[...],
        dimension_numbers=(((1,), (0,)), ((), ())),
        preferred_element_type=jnp.float32,
    ).astype(o_ref.dtype)


def _choose_lane_tile(mw, max_tile=2048):
    """Largest multiple-of-128 divisor of `mw` (capped); prefer >=2 tiles
    so v7x's second TensorCore is not idle."""
    best = None
    t = 128
    while t <= min(mw, max_tile):
        if mw % t == 0:
            best = t
        t += 128
    if best is None:
        return mw                       # ragged minor dim: single full tile
    if mw // best == 1 and best % 256 == 0:
        best //= 2
    return best


def inception_block_pallas(x, branch_weights, compute_dtype=None):
    """x: (N, C_in, H, W) NCHW.  branch_weights: list of torch-layout conv
    weights with shape (F, C_in, 1, k_i), odd k_i, all branches sharing F
    (as in EEG-ITNet).  compute_dtype: optional MXU operand dtype
    (e.g. jnp.bfloat16 on v6e/v5e); accumulation is always f32."""
    N, C, H, W = x.shape
    assert len({w.shape[0] for w in branch_weights}) == 1, "branches must share F"
    assert all(w.shape[3] % 2 == 1 for w in branch_weights), "odd kernels only"
    F = branch_weights[0].shape[0]
    B = len(branch_weights)
    BF = B * F
    K = max(w.shape[3] for w in branch_weights)     # max kernel length (odd)
    KC = K * C
    pad = (K - 1) // 2
    M = N * H
    MW = M * W

    # --- fuse + flatten branch weights: (B*F, K*C) --------------------------
    # w_all[k, c, b*F + f] = branch b's tap k (zero-padded & centred in K)
    w_all = jnp.zeros((K, C, BF), jnp.float32)
    for b, wt in enumerate(branch_weights):
        k = wt.shape[3]
        off = (K - k) // 2
        wk = jnp.transpose(wt[:, :, 0, :], (2, 1, 0))        # (k, C, F)
        w_all = w_all.at[off:off + k, :, b * F:(b + 1) * F].set(wk)
    w_flat = jnp.transpose(w_all, (2, 0, 1)).reshape(BF, KC)  # (B*F, K*C)

    # --- im2col the input once (layout plumbing in the wrapper) -------------
    # slab[k*C + c, m*W + w] = x_pad[m, w + k, c]
    xr = jnp.transpose(x, (0, 2, 3, 1)).reshape(M, W, C)      # NCHW -> (M, W, C)
    x_pad = jnp.pad(xr, ((0, 0), (pad, pad), (0, 0)))         # (M, W + K - 1, C)
    taps = jnp.stack([x_pad[:, k:k + W, :] for k in range(K)], axis=0)  # (K,M,W,C)
    slab = jnp.transpose(taps, (0, 3, 1, 2)).reshape(KC, MW)  # (K*C, M*W)

    if compute_dtype is not None:
        w_flat = w_flat.astype(compute_dtype)
        slab = slab.astype(compute_dtype)

    # --- single fused Pallas matmul over lane-dense tiles --------------------
    tn = _choose_lane_tile(MW)
    grid = (MW // tn,)

    out = pl.pallas_call(
        _fused_inception_matmul_kernel,
        out_shape=jax.ShapeDtypeStruct((BF, MW), x.dtype),
        grid_spec=pltpu.PrefetchScalarGridSpec(
            num_scalar_prefetch=0,
            grid=grid,
            in_specs=[
                pl.BlockSpec((BF, KC), lambda i: (0, 0)),     # weights: resident
                pl.BlockSpec((KC, tn), lambda i: (0, i)),     # slab: lane tiles
            ],
            out_specs=pl.BlockSpec((BF, tn), lambda i: (0, i)),
        ),
        compiler_params=pltpu.CompilerParams(
            dimension_semantics=("parallel",)),
    )(w_flat, slab)

    # (B*F, M*W) -> (N, B*F, H, W); branch-major channels == torch.cat(dim=1)
    out = out.reshape(B, F, N, H, W)
    out = jnp.transpose(out, (2, 0, 1, 3, 4))                 # (N, B, F, H, W)
    return out.reshape(N, BF, H, W)


def _reference(x, branch_weights):
    # Pure-JAX reference: PyTorch Conv2d (1,k) 'same', bias=False, cat on dim 1.
    outs = []
    for wt in branch_weights:
        k = wt.shape[3]
        p = (k - 1) // 2
        o = jax.lax.conv_general_dilated(
            x, wt, window_strides=(1, 1),
            padding=[(0, 0), (p, p)],
            dimension_numbers=("NCHW", "OIHW", "NCHW"))
        outs.append(o)
    return jnp.concatenate(outs, axis=1)


if __name__ == "__main__":
    key = jax.random.PRNGKey(0)
    N, C, H, W = 2, 4, 16, 16          # NCHW input (x: [2, 4, 16, 16])
    F = 8                              # filters per branch
    kernel_sizes = (3, 5, 9)           # three inception branches

    kx, *kws = jax.random.split(key, 1 + len(kernel_sizes))
    x = jax.random.normal(kx, (N, C, H, W), jnp.float32)
    branch_weights = [
        0.1 * jax.random.normal(kw, (F, C, 1, k), jnp.float32)
        for kw, k in zip(kws, kernel_sizes)
    ]

    y = inception_block_pallas(x, branch_weights)
    jax.block_until_ready(y)

    assert y.shape == (N, len(kernel_sizes) * F, H, W)
    y_ref = _reference(x, branch_weights)
    assert jnp.allclose(y, y_ref, atol=1e-4, rtol=1e-4)

    print("KERNEL_OK")
</pallas_src>

<mosaic_0001>
module attributes {stable_mosaic.version = 11 : i64} {
  func.func @_fused_inception_matmul_kernel(%arg0: i32, %arg1: memref<24x36xf32, #tpu.memory_space<vmem>>, %arg2: memref<36x256xf32, #tpu.memory_space<vmem>>, %arg3: memref<24x256xf32, #tpu.memory_space<vmem>>) attributes {dimension_semantics = [#tpu.dimension_semantics<parallel>], iteration_bounds = array<i64: 2>, scalar_prefetch = 0 : i64, scratch_operands = 0 : i64, tpu.core_type = #tpu.core_type<tc>, window_params = [{pipeline_mode = #tpu.pipeline_mode<synchronous>, transform_indices = @transform_0, window_bounds = array<i64: 24, 36>}, {transform_indices = @transform_1, window_bounds = array<i64: 36, 256>}, {transform_indices = @transform_2, window_bounds = array<i64: 24, 256>}]} {
    %c0 = arith.constant 0 : index
    %c0_0 = arith.constant 0 : index
    %0 = vector.load %arg1[%c0, %c0_0] : memref<24x36xf32, #tpu.memory_space<vmem>>, vector<24x36xf32>
    %c0_1 = arith.constant 0 : index
    %c0_2 = arith.constant 0 : index
    %1 = vector.load %arg2[%c0_1, %c0_2] : memref<36x256xf32, #tpu.memory_space<vmem>>, vector<36x256xf32>
    %cst = arith.constant dense<0.000000e+00> : vector<24x256xf32>
    %2 = tpu.matmul %0, %1, %cst {dimension_numbers = #tpu.dot_dimension_numbers<[1], [0], [0], [1], [0, 0, 1, 1], [], []>} : vector<24x36xf32>, vector<36x256xf32>, vector<24x256xf32> -> vector<24x256xf32>
    %c0_3 = arith.constant 0 : index
    %c0_4 = arith.constant 0 : index
    %3 = vector.load %arg3[%c0_3, %c0_4] : memref<24x256xf32, #tpu.memory_space<vmem>>, vector<24x256xf32>
    tpu.vector_store %arg3[%c0_3, %c0_4], %2 {strides = array<i32>} : memref<24x256xf32, #tpu.memory_space<vmem>>, vector<24x256xf32>,
    return
  }
  func.func @transform_0(%arg0: i32) -> (i32, i32) {
    %c0_i32 = arith.constant 0 : i32
    %c0_i32_0 = arith.constant 0 : i32
    %c0_i32_1 = arith.constant 0 : i32
    return %c0_i32, %c0_i32_0 : i32, i32
  }
  func.func @transform_1(%arg0: i32) -> (i32, i32) {
    %c0_i32 = arith.constant 0 : i32
    %c0_i32_0 = arith.constant 0 : i32
    return %c0_i32, %arg0 : i32, i32
  }
  func.func @transform_2(%arg0: i32) -> (i32, i32) {
    %c0_i32 = arith.constant 0 : i32
    %c0_i32_0 = arith.constant 0 : i32
    return %c0_i32, %arg0 : i32, i32
  }
}

</mosaic_0001>

<bundles_post_ra>
// kernel: tpu_custom_call.1
= control target key start
LH: loop header
LB: loop body
LE: loop exit
PB: predicated region body
PF: predicated region fallthrough
CT: control target
= control target key end

     0   :  { %7 = vsyncpa [#allocation3], 0  ;;  %s857_s0 = inlined_call_operand.hbm [shape: f32[24,36], index: 0, kind: input, shape index: {}]   ;;  %s858_s1 = inlined_call_operand.hbm [shape: f32[36,512], index: 1, kind: input, shape index: {}]   ;;  %s859_s2 = inlined_call_operand.hbm [shape: f32[24,512], index: 2, kind: output, shape index: {}]  }
   0x1   :  { %8 = vsyncpa [#allocation6], 0 }
   0x2   :  { %10 = vsyncpa [#allocation6 + $0x1], 0 }
   0x3   :  { %11 = vsyncpa [#allocation4], 0 }
   0x4   :  { %13 = vsyncpa [#allocation4 + $0x1], 0  ;;  %s656_s9 = smov 0   ;;  %s658_s10 = smov 0  }
   0x5   :  { %s660_s11 = smov 0   ;;  %s662_s12 = smov 0  }
   0x6 LB: > { %s677_s13 = sadd.s32 4294967295, %s627_s12   ;;  %s397_s14 = sadd.s32 4294967294, %s627_s12   ;;  %s627_s12 = sphi %s662_s12, %s883_s12   ;;  %s623_s11 = sphi %s660_s11, %s882_s11   ;;  %s619_s10 = sphi %s658_s10, %s881_s10   ;;  %s615_s9 = sphi %s656_s9, %s880_s9  }
   0x7   : > { %s681_s15 = sadd.s32 1, %s627_s12   ;;  %s47_s16 = sadd.s32 1, %s623_s11 }
   0x8   : > { %s44_s17 = ssub.s32 %s627_s12, %s681_s15  ;;  %p54_p0 = scmp.ne.s32.totalorder %s623_s11, %s619_s10 }
   0x9   : > { %p45_p1 = scmp.eq.s32.totalorder %s44_s17, 0  ;;  %p55_p2 = scmp.eq.s32.totalorder %s627_s12, 0 }
   0xa   : > { %p60_p3 = scmp.ne.s32.totalorder %s619_s10, %s615_s9  ;;  %p860_p4 = scmp.eq.s32.totalorder %s677_s13, 0 }
   0xb   : > { %s693_s18 = scalar_select %p45_p1, %s623_s11, %s47_s16  }
   0xc   : > { %p695_p5 = por %p55_p2, %p54_p0  ;;  %p701_p6 = por %p860_p4, %p60_p3 }
   0xd   : > { %p84_p7 = scmp.eq.s32.totalorder %s677_s13, 1  ;;  %p90_p8 = scmp.eq.s32.totalorder %s397_s14, 1 }
   0xe   : > { %s864_s19 = scalar_select %p695_p5, 1, 0 }
   0xf   : > { %s865_s20 = scalar_select %p701_p6, 1, 0 }
  0x10   : > { %p398_p9 = scmp.ge.s32.totalorder %s627_s12, 1  ;;  %p97_p10 = scmp.lt.s32.totalorder %s627_s12, 3 }
  0x11   : > { %p708_p11 = por %p84_p7, %p54_p0  ;;  %p712_p12 = por %p90_p8, %p60_p3 }
  0x12   : > { %p716_p13 = pnand %p398_p9, %p97_p10  ;;  %s629_s24 = smov [#allocation2]  }
  0x13   : > { %s866_s21 = scalar_select %p708_p11, 1, 0 }
  0x14   : > { %s867_s22 = scalar_select %p712_p12, 1, 0 }
  0x15   : > { %s868_s23 = scalar_select %p716_p13, 1, 0 }
  0x16   : > { %p441_p1 = pneg %p716_p13  ;;  %s109_s25 = sshll.u32 %s629_s24, 4  ;;  %s110_s25 = int_to_ptr.vmem [resolvable:$true] %s109_s25 }
  0x17   : > { %s123_s27 = sand.u32 1, %s623_s11   ;;  %s499_s30 = scalar_lea.hbm %s857_s0, 384 }
  0x18   : > { %p724_p2 = pnand %p441_p1, %p860_p4  ;;  %p500_p7 = scmp.ne.s32.totalorder %s857_s0, %s499_s30 }
  0x19   : > { %p506_p1 = scmp.lt.u32.totalorder %s499_s30, %s857_s0 }
  0x1a   : > { %p501_p8 = pneg %p724_p2 }
  0x1c   : > { %p502_p9 = pnand %p501_p8, %p500_p7 }
  0x1e   : > { %p503_p10 = pneg %p502_p9 }
  0x20   : > { %p508_p4 = pnand %p506_p1, %p503_p10 }
  0x22   : > { %511 = shalt.err (!%p508_p4)
}
  0x23   : > { %s512_s7 = scalar_lea.vmem %s110_s25, 384  ;;  %p520_p11 = scmp.lt.s32.totalorder %s110_s25, %s110_s25 }
  0x24   : > { %p513_p0 = scmp.ne.s32.totalorder %s110_s25, %s512_s7  ;;  %p521_p6 = scmp.lt.s32.totalorder %s512_s7, %s512_s7 }
  0x26   : > { %p515_p3 = pnand %p513_p0, %p501_p8  ;;  %p522_p13 = por %p521_p6, %p520_p11 }
  0x28   : > { %p516_p12 = pneg %p515_p3 }
  0x2a   : > { %p523_p5 = pnand %p522_p13, %p516_p12 }
  0x2c   : > { %526 = shalt.err (!%p523_p5)
}
  0x2d   : > { %s630_s8 = smov 128   ;;  %s631_s14 = smov 8  }
  0x2e   : > { %444 = dma.hbm_to_vmem [thread:$0]  (!%p724_p2), %s857_s0, 384, %s110_s25, [#allocation3], %s630_s8, %s630_s8, %s631_s14  }
  0x2f   : > { %p870_p4 = scmp.ne.s32.totalorder %s864_s19, 0  ;;  %p871_p7 = scmp.lt.s32.totalorder %s627_s12, 2 }
  0x30   : > { %s430_s28 = smul.u32 80, %s123_s27  ;;  %s414_s29 = sshll.u32 %s627_s12, 8 }
  0x31   : > { %p751_p0 = pnand %p871_p7, %p870_p4  ;;  %s759_s4 = scalar_lea.hbm %s858_s1, %s414_s29 }
  0x32   : > { %s127_s25 = scalar_lea.vmem [#allocation5], %s430_s28  ;;  %s763_s26 = scalar_lea.sflag [#allocation6], %s123_s27 }
  0x33   : > { %s134_s19 = sshll.u32 %s127_s25, 4  ;;  %s527_s5 = scalar_lea.hbm %s759_s4, 1280  ;;  %s761_s19 = int_to_ptr.vmem [resolvable:$true] %s134_s19 }
  0x34   : > { %p528_p5 = scmp.ne.s32.totalorder %s759_s4, %s527_s5  ;;  %p529_p6 = pneg %p751_p0 }
  0x35   : > { %s532_s8 = scalar_lea.hbm %s858_s1, 2560  ;;  %p533_p13 = scmp.lt.u32.totalorder %s759_s4, %s858_s1 }
  0x36   : > { %p530_p11 = pnand %p529_p6, %p528_p5  ;;  %p534_p2 = scmp.lt.u32.totalorder %s532_s8, %s527_s5 }
  0x37   : > { %p536_p8 = scmp.lt.u32.totalorder %s527_s5, %s759_s4 }
  0x38   : > { %p531_p12 = pneg %p530_p11  ;;  %p535_p3 = por %p534_p2, %p533_p13 }
  0x3a   : > { %p537_p9 = por %p536_p8, %p535_p3 }
  0x3c   : > { %p538_p10 = pnand %p537_p9, %p531_p12 }
  0x3e   : > { %541 = shalt.err (!%p538_p10)
}
  0x3f   : > { %s542_s27 = scalar_lea.vmem %s761_s19, 1280  ;;  %s632_s17 = smov [#allocation5]  }
  0x40   : > { %p543_p1 = scmp.ne.s32.totalorder %s761_s19, %s542_s27  ;;  %s547_s28 = sshll.u32 %s632_s17, 4  ;;  %s548_s28 = int_to_ptr.vmem [resolvable:$false] %s547_s28 }
  0x41   : > { %s549_s29 = scalar_lea.vmem %s548_s28, 2560  ;;  %p550_p5 = scmp.lt.s32.totalorder %s761_s19, %s548_s28 }
  0x42   : > { %p545_p4 = pnand %p543_p1, %p529_p6  ;;  %p551_p11 = scmp.lt.s32.totalorder %s549_s29, %s542_s27 }
  0x44   : > { %p546_p7 = pneg %p545_p4  ;;  %p552_p13 = por %p551_p11, %p550_p5 }
  0x46   : > { %p553_p2 = pnand %p552_p13, %p546_p7 }
  0x48   : > { %556 = shalt.err (!%p553_p2)
}
  0x49   : > { %s633_s30 = smov 512   ;;  %s634_s3 = smov 256  }
  0x4a   : > { %s635_s25 = smov 16   ;;  %p873_p6 = scmp.ne.s32.totalorder %s868_s23, 0 }
  0x4b   : > { %448 = dma.hbm_to_vmem [thread:$0]  (!%p751_p0), %s759_s4, 1280, %s761_s19, %s763_s26, %s633_s30, %s634_s3, %s635_s25  }
  0x4c   : > { %146 = sbr.rel (%p873_p6) target bundleno = 335 (0x14f), region = 28  ;;  %p874_p12 = scmp.eq.s32.totalorder (!%p873_p6), %s677_s13, 0 }
  0x53   : > { %602 = dma.done.wait (%p874_p12), [#allocation3], 384   ;;  %p875_p3 = pmov %p874_p12 }
  0x54   : > { %s798_s5 = sand.u32 1, %s619_s10   ;;  %p876_p8 = scmp.ne.s32.totalorder %s865_s20, 0 }
  0x55   : > { %604 = vsyncadd (%p875_p3), [#allocation3], 4294966912  ;;  %s431_s6 = smul.u32 80, %s798_s5  ;;  %s153_s7 = scalar_lea.sflag [#allocation6], %s798_s5 }
  0x57   : > { %s156_s8 = scalar_lea.vmem [#allocation5], %s431_s6 }
  0x58   : > { %606 = dma.done.wait (%p876_p8), %s153_s7, 1280  }
  0x59   : > { %608 = vsyncadd (%p876_p8), %s153_s7, 4294966016  ;;  %v636_v0 = vmov 0.0   ;;  %v183_v1 = vld [vmem:[%s156_s8 + $0x8] sm:$0xff]  ;;  %v185_v2 = vld [vmem:[%s156_s8 + $0x18] sm:$0xff]  ;;  %vm202_vm0 = vcmask 1043456   ;;  %vm192_vm1 = vcmask 293888  }
  0x5a   : > { %279 = vmatprep.mubr.f32.mxu1 %v636_v0  ;;  %273 = vmatprep.mubr.f32.mxu0 %v636_v0  ;;  %v182_v3 = vld [vmem:[%s156_s8] sm:$0xff]  ;;  %v416_v4 = vpack.c.bf16 %v185_v2, %v183_v1  ;;  %v184_v5 = vld [vmem:[%s156_s8 + $0x10] sm:$0xff]  ;;  %v187_v6 = vld [vmem:[%s156_s8 + $0x28] sm:$0xff]  ;;  %s432_s20 = smul.u32 48, %s798_s5  ;;  %s415_s4 = sshll.u32 %s677_s13, 8 }
  0x5b   : > { %v189_v7 = vld [vmem:[%s156_s8 + $0x38] sm:$0xff]  ;;  %v418_v8 = vpack.c.bf16 %v184_v5, %v182_v3  ;;  %v186_v10 = vld [vmem:[%s156_s8 + $0x20] sm:$0xff]  ;;  %v188_v11 = vld [vmem:[%s156_s8 + $0x30] sm:$0xff]  ;;  %s813_s14 = scalar_lea.hbm %s859_s2, %s415_s4  ;;  %s299_s13 = scalar_lea.sflag [#allocation4], %s798_s5 }
  0x5c   : > { %v420_v9 = vpack.c.bf16 %v189_v7, %v187_v6  ;;  %424 = vmatprep.subr.bf16.mxu1 %v416_v4  ;;  %417 = vmatprep.subr.bf16.mxu0 %v416_v4  ;;  %v422_v12 = vpack.c.bf16 %v188_v11, %v186_v10  ;;  %v191_v13 = vld [vmem:[%s156_s8 + $0x48] sm:$0xf]  ;;  %v190_v14 = vld [vmem:[%s156_s8 + $0x40] sm:$0xf]  ;;  %s176_s23 = scalar_lea.vmem [#allocation7], %s432_s20  ;;  %p877_p9 = scmp.ne.s32.totalorder %s866_s21, 0 }
  0x5d   : > { %427 = vmatpush1.bf16.msra.mxu1 %v418_v8  ;;  %419 = vmatpush1.bf16.msra.mxu0 %v418_v8  ;;  %v180_v15 = vld [vmem:[#allocation2 + $0x8] sm:$0xff]  ;;  %v179_v16 = vld [vmem:[#allocation2] sm:$0xff]  ;;  %v181_v17 = vld [vmem:[#allocation2 + $0x10] sm:$0xff]  ;;  %s312_s24 = sshll.u32 %s176_s23, 4  ;;  %s637_s27 = smov [#allocation7]   ;;  %s808_s24 = int_to_ptr.vmem [resolvable:$true] %s312_s24 }
  0x5e   : > { %425 = vmatprep.subr.bf16.mxu1 %v420_v9  ;;  %421 = vmatprep.subr.bf16.mxu0 %v420_v9  ;;  %s557_s16 = scalar_lea.vmem %s808_s24, 768  ;;  %s561_s17 = sshll.u32 %s637_s27, 4  ;;  %s562_s17 = int_to_ptr.vmem [resolvable:$false] %s561_s17 }
  0x5f   : > { %p558_p0 = scmp.ne.s32.totalorder %s808_s24, %s557_s16  ;;  %s563_s28 = scalar_lea.vmem %s562_s17, 1536 }
  0x60   : > { %p564_p4 = scmp.lt.s32.totalorder %s808_s24, %s562_s17  ;;  %p565_p7 = scmp.lt.s32.totalorder %s563_s28, %s557_s16 }
  0x61   : > { %428 = vmatpush1.bf16.msra.mxu1 %v422_v12  ;;  %423 = vmatpush1.bf16.msra.mxu0 %v422_v12  ;;  %p559_p10 = pnand %p558_p0, %p877_p9 }
  0x62   : > { %426 = vmatprep.subr.msk.mxu1 %vm202_vm0, %v191_v13  ;;  %405 = vmatprep.subr.msk.mxu0 %vm202_vm0, %v191_v13  ;;  %p566_p5 = por %p565_p7, %p564_p4 }
  0x63   : > { %p560_p1 = pneg %p559_p10 }
  0x65   : > { %429 = vmatpush1.msk.msra.mxu1 %vm202_vm0, %v190_v14  ;;  %406 = vmatpush1.msk.msra.mxu0 %vm202_vm0, %v190_v14  ;;  %p567_p11 = pnand %p566_p5, %p560_p1 }
  0x66   : > { %408 = vmatmul.mubr.msk.f32.vlgmr.msra.gmra.mrb[0].mxu1 %vm192_vm1, %v180_v15  ;;  %407 = vmatmul.mubr.msk.f32.vlgmr.msra.gmra.mrb[0].mxu0 %vm192_vm1, %v179_v16 }
  0x67   : > { %285 = vmatprep.mubr.f32.mxu1 %v636_v0 }
  0x6a   : > { %409 = vmatmul.mubr.msk.f32.gmra.mrb[2].mxu1 %vm192_vm1, %v181_v17 }
 0x139   : > { %v281_v18 = vpop.f32.mrb[0].mxu1  ;;  %v275_v19 = vpop.f32.mrb[0].mxu0 }
 0x13a   : > { %294 = vst [vmem:[%s176_s23 + $0x10] sm:$0xff] %v281_v18  ;;  %v283_v20 = vpop.f32.mrb[1].mxu1  ;;  %292 = vst [vmem:[%s176_s23] sm:$0xff] %v275_v19  ;;  %v277_v21 = vpop.f32.mrb[1].mxu0 }
 0x13b   : > { %295 = vst [vmem:[%s176_s23 + $0x18] sm:$0xff] %v283_v20  ;;  %293 = vst [vmem:[%s176_s23 + $0x8] sm:$0xff] %v277_v21 }
 0x13d   : > { %v287_v22 = vpop.f32.mrb[2].mxu1 }
 0x13e   : > { %296 = vst [vmem:[%s176_s23 + $0x20] sm:$0xff] %v287_v22  ;;  %v289_v23 = vpop.f32.mrb[3].mxu1 }
 0x13f   : > { %297 = vst [vmem:[%s176_s23 + $0x28] sm:$0xff] %v289_v23 }
 0x140   : > { %570 = shalt.err (!%p567_p11)
}
 0x141   : > { %s571_s29 = scalar_lea.hbm %s813_s14, 768  ;;  %s575_s25 = scalar_lea.hbm %s859_s2, 1536 }
 0x142   : > { %p572_p13 = scmp.ne.s32.totalorder %s813_s14, %s571_s29  ;;  %p576_p12 = scmp.lt.u32.totalorder %s813_s14, %s859_s2 }
 0x143   : > { %p577_p3 = scmp.lt.u32.totalorder %s575_s25, %s571_s29  ;;  %p579_p0 = scmp.lt.u32.totalorder %s571_s29, %s813_s14 }
 0x144   : > { %p573_p2 = pnand %p572_p13, %p877_p9 }
 0x145   : > { %p578_p8 = por %p577_p3, %p576_p12 }
 0x146   : > { %p574_p6 = pneg %p573_p2 }
 0x147   : > { %p580_p10 = por %p579_p0, %p578_p8 }
 0x149   : > { %p581_p1 = pnand %p580_p10, %p574_p6 }
 0x14b   : > { %584 = shalt.err (!%p581_p1)
}
 0x14c   : > { %s638_s8 = smov 256   ;;  %s639_s20 = smov 512  }
 0x14d   : > { %s640_s23 = smov 16  }
 0x14e   : > { %439 = dma.vmem_to_hbm [thread:$0]  (%p877_p9), %s808_s24, 768, %s813_s14, %s299_s13, %s638_s8, %s639_s20, %s640_s23  }
 0x14f PF: > { %s327_s4 = sand.u32 1, %s615_s9   ;;  %p878_p4 = scmp.ne.s32.totalorder %s867_s22, 0 }
 0x150   : > { %p879_p7 = scmp.ge.s32.totalorder %s627_s12, 2  ;;  %s328_s19 = scalar_lea.sflag [#allocation4], %s327_s4 }
 0x152   : > { %p450_p5 = pnand %p879_p7, %p878_p4 }
 0x154   : > { %610 = dma.done.wait (!%p450_p5), %s328_s19, 768  }
 0x155   : > { %612 = vsyncadd (!%p450_p5), %s328_s19, 4294966528  ;;  %p16_p11 = scmp.ge.s32.totalorder %s681_s15, 4   ;;  %s880_s9 = smov %s619_s10 }
 0x156   : > { %s881_s10 = smov %s623_s11  ;;  %s882_s11 = smov %s693_s18 }
 0x157   : > { %s883_s12 = smov %s681_s15  ;;  %18 = sbr.rel (!%p16_p11) target bundleno = 6 (0x6), region = 78 }
 0x15e   :  { %333 = vsyncpa [#allocation3], 1 }
 0x15f   :  { %335 = vsyncpa [#allocation3 + $0x1], 1 }
 0x160   :  { %336 = vsyncpa [#allocation6], 1 }
 0x161   :  { %338 = vsyncpa [#allocation6 + $0x1], 1 }
 0x162   :  { %339 = vsyncpa [#allocation4], 1 }
 0x163   :  { %341 = vsyncpa [#allocation4 + $0x1], 1 }

</bundles_post_ra>
